<compile_context>
chip_gen: v7x
topology: tpu7x:2x2x1
jax: 0.10.0
libtpu: 0.0.40
codegen_flags: <defaults>
</compile_context>

<pallas_src>
import functools

import jax
import jax.numpy as jnp
from jax.experimental import pallas as pl
from jax.experimental.pallas import tpu as pltpu

_LANE = 128
_SUBLANE = 8
_SUPPORTED_ACTS = ("relu", "tanh", None)


def _round_up(x, m):
    return ((x + m - 1) // m) * m


def _apply_act(h, act):
    if act == "relu":
        return jnp.maximum(h, 0.0)
    if act == "tanh":
        return jnp.tanh(h)  # EUP slot, essentially free next to the MXU
    return h


# ----------------------------------------------------------------------------- kernel body
def _mlp_fused_kernel(*refs, n_inputs, act):
    """Fused MLP forward for one batch tile.

    refs layout (positional):
      x_0 ... x_{n_inputs-1},                      # input tiles  (TB, d_i)
      W0_chunk_0 ... W0_chunk_{n_inputs-1}, b0,    # first layer (weight split per input)
      W1, b1, ..., WL, bL,                         # hidden layers + (lane-padded) output layer
      o_ref                                        # output tile (TB, out_pad)
    """
    x_refs = refs[:n_inputs]
    o_ref = refs[-1]
    params = refs[n_inputs:-1]

    w0_chunks = params[:n_inputs]
    b0_ref = params[n_inputs]
    rest = params[n_inputs + 1:]
    n_rest = len(rest) // 2

    def mm(x, w):
        # Cast MXU lhs to the weight dtype (bf16 weights supported); accumulate in f32.
        lhs = x if x.dtype == w.dtype else x.astype(w.dtype)
        return jnp.dot(lhs, w, preferred_element_type=jnp.float32)

    # Layer 0: concat folded into the matmul -> sum_i x_i @ W0_i  (f32 accumulation).
    h = mm(x_refs[0][...], w0_chunks[0][...])
    for xr, wr in zip(x_refs[1:], w0_chunks[1:]):
        h = h + mm(xr[...], wr[...])
    h = h + b0_ref[...].astype(jnp.float32)
    if act is not None and n_rest > 0:
        h = _apply_act(h, act)

    # Hidden layers + output layer, statically unrolled. Activation on all but the last.
    for li in range(n_rest):
        w = rest[2 * li]
        b = rest[2 * li + 1]
        h = mm(h, w[...]) + b[...].astype(jnp.float32)
        if act is not None and li < n_rest - 1:
            h = _apply_act(h, act)

    o_ref[...] = h.astype(o_ref.dtype) if h.dtype != o_ref.dtype else h


# ------------------------------------------------------------------------------ tile sizing
def _choose_tb(B8, hidden_units):
    """Pick a batch-tile size (multiple of 8) for the 8-rounded batch B8."""
    # Cap the tile so the (tb, hidden) f32 activation live range stays bounded (spill guard).
    if hidden_units >= 512:
        cap = 256
    elif hidden_units >= 128:
        cap = 512
    else:
        cap = 1024
    if B8 <= cap:
        # Prefer >=2 (ideally 4) tiles so v7x megacore splits the batch, but keep tiles
        # >=128 rows so per-grid-step overhead (~0.35us) stays amortized.
        for nt in (4, 2):
            if B8 % nt == 0:
                t = B8 // nt
                if t >= 128 and t % _SUBLANE == 0:
                    return t
        return B8
    # Largest multiple of 8 <= cap that divides B8 -> no whole-array pad copy needed.
    t = (cap // _SUBLANE) * _SUBLANE
    while t >= _SUBLANE:
        if B8 % t == 0:
            return t
        t -= _SUBLANE
    return cap


# --------------------------------------------------------------------------- fused forward
def mlp_forward_fused(xs, layers, *, activation="relu", tb=None):
    """Fused MLP forward.

    xs:     list of (B, d_i) arrays (conceptually concatenated along axis 1).
    layers: list of (W, b) with W: (in, out), b: (1, out). First layer in = sum(d_i).
    """
    if activation not in _SUPPORTED_ACTS:
        raise NotImplementedError(
            f"activation={activation!r} is not supported inside the fused kernel "
            f"(supported: {_SUPPORTED_ACTS})")

    xs = [jnp.asarray(x) for x in xs]
    B = int(xs[0].shape[0])
    in_dims = [int(x.shape[1]) for x in xs]
    sum_d = sum(in_dims)
    hidden = int(layers[0][0].shape[1])
    out_features = int(layers[-1][0].shape[1])
    out_dtype = xs[0].dtype

    # Small / unaligned inputs: one cheap HBM concat beats per-input masked matmuls and
    # extra DMA descriptors on every grid step.
    if len(xs) > 1 and sum_d <= 256:
        xs = [jnp.concatenate(xs, axis=1)]
        in_dims = [sum_d]

    # First-layer weight split per (possibly concatenated) input.
    w0, b0 = layers[0]
    w0_chunks = []
    off = 0
    for d in in_dims:
        w0_chunks.append(w0[off:off + d, :])
        off += d

    # Lane-dense output: pad the last layer's columns to a 128 multiple so the output tile
    # is written with full (unmasked) vector stores; columns are sliced off in the wrapper.
    rest_layers = list(layers[1:])
    out_pad = _round_up(out_features, _LANE)
    if out_pad != out_features:
        pad_cols = out_pad - out_features
        if rest_layers:
            w_l, b_l = rest_layers[-1]
            rest_layers[-1] = (jnp.pad(w_l, ((0, 0), (0, pad_cols))),
                               jnp.pad(b_l, ((0, 0), (0, pad_cols))))
        else:
            w0_chunks = [jnp.pad(wc, ((0, 0), (0, pad_cols))) for wc in w0_chunks]
            b0 = jnp.pad(b0, ((0, 0), (0, pad_cols)))

    # Batch tiling.
    B8 = _round_up(B, _SUBLANE)
    if tb is None:
        tb = _choose_tb(B8, hidden)
    tb = max(_SUBLANE, _round_up(int(tb), _SUBLANE))
    n_tiles = pl.cdiv(B8, tb)
    B_pad = n_tiles * tb
    if B_pad != B:
        xs = [jnp.pad(x, ((0, B_pad - B), (0, 0))) for x in xs]
    n_inputs = len(xs)

    # Operand list (order must match the kernel's ref layout).
    operands = list(xs) + list(w0_chunks) + [b0]
    for (w, b) in rest_layers:
        operands.extend([w, b])

    # VMEM budget: resident params (x2 in case single-buffering is unavailable) + double-
    # buffered x/out tiles + activation headroom, clamped to a ceiling safe on v7x's 64 MiB.
    param_bytes = sum(int(a.size) * a.dtype.itemsize for a in operands[n_inputs:])
    xtile_bytes = sum(tb * int(x.shape[1]) * x.dtype.itemsize for x in xs)
    otile_bytes = tb * out_pad * jnp.dtype(out_dtype).itemsize
    max_width = max([hidden, out_pad] + [int(x.shape[1]) for x in xs])
    act_bytes = tb * max_width * 4
    need = 2 * param_bytes + 2 * (xtile_bytes + otile_bytes) + 4 * act_bytes
    vmem_limit = int(min(max(need + (4 << 20), 32 << 20), 56 << 20))

    # Advisory cost estimate for XLA's scheduler.
    flops = sum(2 * B_pad * int(wc.shape[0]) * int(wc.shape[1]) for wc in w0_chunks)
    flops += sum(2 * B_pad * int(w.shape[0]) * int(w.shape[1]) for (w, _b) in rest_layers)
    transcendentals = B_pad * hidden * len(rest_layers) if activation == "tanh" else 0
    bytes_accessed = (sum(int(a.size) * a.dtype.itemsize for a in operands)
                      + B_pad * out_pad * jnp.dtype(out_dtype).itemsize)

    kernel = functools.partial(_mlp_fused_kernel, n_inputs=n_inputs, act=activation)

    def _call(single_buffer_params):
        def resident_spec(shape):
            idx = lambda i, _nd=len(shape): (0,) * _nd
            if single_buffer_params:
                try:
                    # Constant index_map -> double buffering buys nothing; halve param VMEM.
                    return pl.BlockSpec(shape, idx, pipeline_mode=pl.Buffered(1))
                except TypeError:
                    pass
            return pl.BlockSpec(shape, idx)

        in_specs = []
        for x in xs:
            in_specs.append(pl.BlockSpec((tb, int(x.shape[1])), lambda i: (i, 0)))
        for wc in w0_chunks:
            in_specs.append(resident_spec(wc.shape))
        in_specs.append(resident_spec(b0.shape))
        for (w, b) in rest_layers:
            in_specs.append(resident_spec(w.shape))
            in_specs.append(resident_spec(b.shape))
        out_spec = pl.BlockSpec((tb, out_pad), lambda i: (i, 0))

        return pl.pallas_call(
            kernel,
            out_shape=jax.ShapeDtypeStruct((B_pad, out_pad), out_dtype),
            grid=(n_tiles,),
            in_specs=in_specs,
            out_specs=out_spec,
            compiler_params=pltpu.CompilerParams(
                dimension_semantics=("parallel",),   # megacore: batch tiles split across TCs
                vmem_limit_bytes=vmem_limit),
            cost_estimate=pl.CostEstimate(
                flops=flops, transcendentals=transcendentals,
                bytes_accessed=bytes_accessed),
        )(*operands)

    try:
        out = _call(True)
    except Exception:
        # Fallback if this jax version rejects single-buffered resident params.
        out = _call(False)

    if B_pad != B or out_pad != out_features:
        out = out[:B, :out_features]
    return out


# ------------------------------------------------------------------------------ param init
def init_linear_params(key, in_features, out_features, dtype=jnp.float32):
    # Mimic torch.nn.Linear default init: U(-1/sqrt(fan_in), 1/sqrt(fan_in)).
    kw, kb = jax.random.split(key)
    bound = 1.0 / float(in_features) ** 0.5
    # Stored already transposed: (in_features, out_features), so kernel does y = x @ W + b.
    w = jax.random.uniform(kw, (in_features, out_features), dtype, -bound, bound)
    b = jax.random.uniform(kb, (1, out_features), dtype, -bound, bound)
    return w, b


class LinearNetworkPallas:
    """JAX/Pallas port of LinearNetwork.

    activation: "relu", "tanh", or None (fused inside the kernel; other callables raise).
    dtype: parameter storage dtype; jnp.bfloat16 halves resident-weight VMEM and weight DMA
           while keeping f32 MXU accumulation and f32 bias/activation math.
    """

    def __init__(self, inputs, outputs, n_hidden_layers, n_hidden_units,
                 activation="relu", activation_last_layer=None, output_weight=1.0,
                 dtype=jnp.float32, key=jax.random.PRNGKey(42)):
        if activation not in _SUPPORTED_ACTS:
            raise NotImplementedError(
                f"activation={activation!r} not supported (use one of {_SUPPORTED_ACTS})")
        self.activation = activation
        self.activation_last_layer = activation_last_layer
        self.output_weight = output_weight
        keys = jax.random.split(key, n_hidden_layers + 2)
        layers = [init_linear_params(keys[0], inputs, n_hidden_units, dtype)]
        for i in range(n_hidden_layers):
            layers.append(
                init_linear_params(keys[1 + i], n_hidden_units, n_hidden_units, dtype))
        layers.append(init_linear_params(keys[-1], n_hidden_units, outputs, dtype))
        self.layers = layers

    def __call__(self, *inputs):
        out = mlp_forward_fused(list(inputs), self.layers, activation=self.activation)
        if self.activation_last_layer is not None:
            # TODO(synk): last-layer activation + output_weight run as plain JAX ops
            # (arbitrary callables can't be fused into the kernel).
            out = self.activation_last_layer(out) * self.output_weight
        return out


# ------------------------------------------------------------------------------------ main
if __name__ == "__main__":
    key = jax.random.PRNGKey(0)
    k1, k2, k3 = jax.random.split(key, 3)

    def ref_forward(layers, *inputs):
        x = jnp.concatenate(list(inputs), axis=1) if len(inputs) > 1 else inputs[0]
        n = len(layers)
        for li, (w, b) in enumerate(layers):
            x = x @ w + b
            if li < n - 1:
                x = jnp.maximum(x, 0.0)
        return x

    # Case 1: two unaligned inputs (12 + 20 = 32 features), 2 hidden layers of 32, 8 outputs.
    batch = 8
    x1 = jax.random.normal(k1, (batch, 12), jnp.float32)
    x2 = jax.random.normal(k2, (batch, 20), jnp.float32)
    net = LinearNetworkPallas(inputs=32, outputs=8, n_hidden_layers=2, n_hidden_units=32)
    out = net(x1, x2)
    jax.block_until_ready(out)
    ref = ref_forward(net.layers, x1, x2)
    assert out.shape == (batch, 8)
    assert jnp.allclose(out, ref, atol=1e-5, rtol=1e-5)

    # Case 2: multi-tile grid (batch 272 -> 2 tiles of 136) with a lane-padded 3-wide output.
    batch2 = 272
    x3 = jax.random.normal(k3, (batch2, 48), jnp.float32)
    net2 = LinearNetworkPallas(inputs=48, outputs=3, n_hidden_layers=1, n_hidden_units=64,
                               key=jax.random.PRNGKey(7))
    out2 = net2(x3)
    jax.block_until_ready(out2)
    ref2 = ref_forward(net2.layers, x3)
    assert out2.shape == (batch2, 3)
    assert jnp.allclose(out2, ref2, atol=1e-5, rtol=1e-5)

    print("KERNEL_OK")
</pallas_src>

<mosaic_0001>
module attributes {stable_mosaic.version = 11 : i64} {
  func.func @_mlp_fused_kernel(%arg0: i32, %arg1: memref<8x32xf32, #tpu.memory_space<vmem>>, %arg2: memref<32x32xf32, #tpu.memory_space<vmem>>, %arg3: memref<1x32xf32, #tpu.memory_space<vmem>>, %arg4: memref<32x32xf32, #tpu.memory_space<vmem>>, %arg5: memref<1x32xf32, #tpu.memory_space<vmem>>, %arg6: memref<32x32xf32, #tpu.memory_space<vmem>>, %arg7: memref<1x32xf32, #tpu.memory_space<vmem>>, %arg8: memref<32x128xf32, #tpu.memory_space<vmem>>, %arg9: memref<1x128xf32, #tpu.memory_space<vmem>>, %arg10: memref<8x128xf32, #tpu.memory_space<vmem>>) attributes {dimension_semantics = [#tpu.dimension_semantics<parallel>], iteration_bounds = array<i64: 1>, scalar_prefetch = 0 : i64, scratch_operands = 0 : i64, tpu.core_type = #tpu.core_type<tc>, window_params = [{transform_indices = @transform_0, window_bounds = array<i64: 8, 32>}, {pipeline_mode = #tpu.pipeline_mode<synchronous>, transform_indices = @transform_1, window_bounds = array<i64: 32, 32>}, {pipeline_mode = #tpu.pipeline_mode<synchronous>, transform_indices = @transform_2, window_bounds = array<i64: 1, 32>}, {pipeline_mode = #tpu.pipeline_mode<synchronous>, transform_indices = @transform_3, window_bounds = array<i64: 32, 32>}, {pipeline_mode = #tpu.pipeline_mode<synchronous>, transform_indices = @transform_4, window_bounds = array<i64: 1, 32>}, {pipeline_mode = #tpu.pipeline_mode<synchronous>, transform_indices = @transform_5, window_bounds = array<i64: 32, 32>}, {pipeline_mode = #tpu.pipeline_mode<synchronous>, transform_indices = @transform_6, window_bounds = array<i64: 1, 32>}, {pipeline_mode = #tpu.pipeline_mode<synchronous>, transform_indices = @transform_7, window_bounds = array<i64: 32, 128>}, {pipeline_mode = #tpu.pipeline_mode<synchronous>, transform_indices = @transform_8, window_bounds = array<i64: 1, 128>}, {transform_indices = @transform_9, window_bounds = array<i64: 8, 128>}]} {
    %c0 = arith.constant 0 : index
    %c0_0 = arith.constant 0 : index
    %0 = vector.load %arg1[%c0, %c0_0] : memref<8x32xf32, #tpu.memory_space<vmem>>, vector<8x32xf32>
    %c0_1 = arith.constant 0 : index
    %c0_2 = arith.constant 0 : index
    %1 = vector.load %arg2[%c0_1, %c0_2] : memref<32x32xf32, #tpu.memory_space<vmem>>, vector<32x32xf32>
    %cst = arith.constant dense<0.000000e+00> : vector<8x32xf32>
    %2 = tpu.matmul %0, %1, %cst {dimension_numbers = #tpu.dot_dimension_numbers<[1], [0], [0], [1], [0, 0, 1, 1], [], []>} : vector<8x32xf32>, vector<32x32xf32>, vector<8x32xf32> -> vector<8x32xf32>
    %c0_3 = arith.constant 0 : index
    %c0_4 = arith.constant 0 : index
    %3 = vector.load %arg3[%c0_3, %c0_4] : memref<1x32xf32, #tpu.memory_space<vmem>>, vector<1x32xf32>
    %4 = vector.broadcast %3 : vector<1x32xf32> to vector<8x32xf32>
    %5 = arith.addf %2, %4 : vector<8x32xf32>
    %cst_5 = arith.constant 0.000000e+00 : f32
    %6 = vector.broadcast %cst_5 : f32 to vector<8x32xf32>
    %7 = arith.maximumf %5, %6 : vector<8x32xf32>
    %c0_6 = arith.constant 0 : index
    %c0_7 = arith.constant 0 : index
    %8 = vector.load %arg4[%c0_6, %c0_7] : memref<32x32xf32, #tpu.memory_space<vmem>>, vector<32x32xf32>
    %cst_8 = arith.constant dense<0.000000e+00> : vector<8x32xf32>
    %9 = tpu.matmul %7, %8, %cst_8 {dimension_numbers = #tpu.dot_dimension_numbers<[1], [0], [0], [1], [0, 0, 1, 1], [], []>} : vector<8x32xf32>, vector<32x32xf32>, vector<8x32xf32> -> vector<8x32xf32>
    %c0_9 = arith.constant 0 : index
    %c0_10 = arith.constant 0 : index
    %10 = vector.load %arg5[%c0_9, %c0_10] : memref<1x32xf32, #tpu.memory_space<vmem>>, vector<1x32xf32>
    %11 = vector.broadcast %10 : vector<1x32xf32> to vector<8x32xf32>
    %12 = arith.addf %9, %11 : vector<8x32xf32>
    %cst_11 = arith.constant 0.000000e+00 : f32
    %13 = vector.broadcast %cst_11 : f32 to vector<8x32xf32>
    %14 = arith.maximumf %12, %13 : vector<8x32xf32>
    %c0_12 = arith.constant 0 : index
    %c0_13 = arith.constant 0 : index
    %15 = vector.load %arg6[%c0_12, %c0_13] : memref<32x32xf32, #tpu.memory_space<vmem>>, vector<32x32xf32>
    %cst_14 = arith.constant dense<0.000000e+00> : vector<8x32xf32>
    %16 = tpu.matmul %14, %15, %cst_14 {dimension_numbers = #tpu.dot_dimension_numbers<[1], [0], [0], [1], [0, 0, 1, 1], [], []>} : vector<8x32xf32>, vector<32x32xf32>, vector<8x32xf32> -> vector<8x32xf32>
    %c0_15 = arith.constant 0 : index
    %c0_16 = arith.constant 0 : index
    %17 = vector.load %arg7[%c0_15, %c0_16] : memref<1x32xf32, #tpu.memory_space<vmem>>, vector<1x32xf32>
    %18 = vector.broadcast %17 : vector<1x32xf32> to vector<8x32xf32>
    %19 = arith.addf %16, %18 : vector<8x32xf32>
    %cst_17 = arith.constant 0.000000e+00 : f32
    %20 = vector.broadcast %cst_17 : f32 to vector<8x32xf32>
    %21 = arith.maximumf %19, %20 : vector<8x32xf32>
    %c0_18 = arith.constant 0 : index
    %c0_19 = arith.constant 0 : index
    %22 = vector.load %arg8[%c0_18, %c0_19] : memref<32x128xf32, #tpu.memory_space<vmem>>, vector<32x128xf32>
    %cst_20 = arith.constant dense<0.000000e+00> : vector<8x128xf32>
    %23 = tpu.matmul %21, %22, %cst_20 {dimension_numbers = #tpu.dot_dimension_numbers<[1], [0], [0], [1], [0, 0, 1, 1], [], []>} : vector<8x32xf32>, vector<32x128xf32>, vector<8x128xf32> -> vector<8x128xf32>
    %c0_21 = arith.constant 0 : index
    %c0_22 = arith.constant 0 : index
    %24 = vector.load %arg9[%c0_21, %c0_22] : memref<1x128xf32, #tpu.memory_space<vmem>>, vector<1x128xf32>
    %25 = vector.broadcast %24 : vector<1x128xf32> to vector<8x128xf32>
    %26 = arith.addf %23, %25 : vector<8x128xf32>
    %c0_23 = arith.constant 0 : index
    %c0_24 = arith.constant 0 : index
    %27 = vector.load %arg10[%c0_23, %c0_24] : memref<8x128xf32, #tpu.memory_space<vmem>>, vector<8x128xf32>
    tpu.vector_store %arg10[%c0_23, %c0_24], %26 {strides = array<i32>} : memref<8x128xf32, #tpu.memory_space<vmem>>, vector<8x128xf32>,
    return
  }
  func.func @transform_0(%arg0: i32) -> (i32, i32) {
    %c0_i32 = arith.constant 0 : i32
    %c0_i32_0 = arith.constant 0 : i32
    return %arg0, %c0_i32 : i32, i32
  }
  func.func @transform_1(%arg0: i32) -> (i32, i32) {
    %c0_i32 = arith.constant 0 : i32
    %c0_i32_0 = arith.constant 0 : i32
    %c0_i32_1 = arith.constant 0 : i32
    return %c0_i32, %c0_i32_0 : i32, i32
  }
  func.func @transform_2(%arg0: i32) -> (i32, i32) {
    %c0_i32 = arith.constant 0 : i32
    %c0_i32_0 = arith.constant 0 : i32
    %c0_i32_1 = arith.constant 0 : i32
    return %c0_i32, %c0_i32_0 : i32, i32
  }
  func.func @transform_3(%arg0: i32) -> (i32, i32) {
    %c0_i32 = arith.constant 0 : i32
    %c0_i32_0 = arith.constant 0 : i32
    %c0_i32_1 = arith.constant 0 : i32
    return %c0_i32, %c0_i32_0 : i32, i32
  }
  func.func @transform_4(%arg0: i32) -> (i32, i32) {
    %c0_i32 = arith.constant 0 : i32
    %c0_i32_0 = arith.constant 0 : i32
    %c0_i32_1 = arith.constant 0 : i32
    return %c0_i32, %c0_i32_0 : i32, i32
  }
  func.func @transform_5(%arg0: i32) -> (i32, i32) {
    %c0_i32 = arith.constant 0 : i32
    %c0_i32_0 = arith.constant 0 : i32
    %c0_i32_1 = arith.constant 0 : i32
    return %c0_i32, %c0_i32_0 : i32, i32
  }
  func.func @transform_6(%arg0: i32) -> (i32, i32) {
    %c0_i32 = arith.constant 0 : i32
    %c0_i32_0 = arith.constant 0 : i32
    %c0_i32_1 = arith.constant 0 : i32
    return %c0_i32, %c0_i32_0 : i32, i32
  }
  func.func @transform_7(%arg0: i32) -> (i32, i32) {
    %c0_i32 = arith.constant 0 : i32
    %c0_i32_0 = arith.constant 0 : i32
    %c0_i32_1 = arith.constant 0 : i32
    return %c0_i32, %c0_i32_0 : i32, i32
  }
  func.func @transform_8(%arg0: i32) -> (i32, i32) {
    %c0_i32 = arith.constant 0 : i32
    %c0_i32_0 = arith.constant 0 : i32
    %c0_i32_1 = arith.constant 0 : i32
    return %c0_i32, %c0_i32_0 : i32, i32
  }
  func.func @transform_9(%arg0: i32) -> (i32, i32) {
    %c0_i32 = arith.constant 0 : i32
    %c0_i32_0 = arith.constant 0 : i32
    return %arg0, %c0_i32 : i32, i32
  }
}

module attributes {stable_mosaic.version = 11 : i64} {
  func.func @_mlp_fused_kernel(%arg0: i32, %arg1: memref<8x32xf32, #tpu.memory_space<vmem>>, %arg2: memref<32x32xf32, #tpu.memory_space<vmem>>, %arg3: memref<1x32xf32, #tpu.memory_space<vmem>>, %arg4: memref<32x32xf32, #tpu.memory_space<vmem>>, %arg5: memref<1x32xf32, #tpu.memory_space<vmem>>, %arg6: memref<32x32xf32, #tpu.memory_space<vmem>>, %arg7: memref<1x32xf32, #tpu.memory_space<vmem>>, %arg8: memref<32x128xf32, #tpu.memory_space<vmem>>, %arg9: memref<1x128xf32, #tpu.memory_space<vmem>>, %arg10: memref<8x128xf32, #tpu.memory_space<vmem>>) attributes {dimension_semantics = [#tpu.dimension_semantics<parallel>], iteration_bounds = array<i64: 1>, scalar_prefetch = 0 : i64, scratch_operands = 0 : i64, tpu.core_type = #tpu.core_type<tc>, window_params = [{transform_indices = @transform_0, window_bounds = array<i64: 8, 32>}, {pipeline_mode = #tpu.pipeline_mode<synchronous>, transform_indices = @transform_1, window_bounds = array<i64: 32, 32>}, {pipeline_mode = #tpu.pipeline_mode<synchronous>, transform_indices = @transform_2, window_bounds = array<i64: 1, 32>}, {pipeline_mode = #tpu.pipeline_mode<synchronous>, transform_indices = @transform_3, window_bounds = array<i64: 32, 32>}, {pipeline_mode = #tpu.pipeline_mode<synchronous>, transform_indices = @transform_4, window_bounds = array<i64: 1, 32>}, {pipeline_mode = #tpu.pipeline_mode<synchronous>, transform_indices = @transform_5, window_bounds = array<i64: 32, 32>}, {pipeline_mode = #tpu.pipeline_mode<synchronous>, transform_indices = @transform_6, window_bounds = array<i64: 1, 32>}, {pipeline_mode = #tpu.pipeline_mode<synchronous>, transform_indices = @transform_7, window_bounds = array<i64: 32, 128>}, {pipeline_mode = #tpu.pipeline_mode<synchronous>, transform_indices = @transform_8, window_bounds = array<i64: 1, 128>}, {transform_indices = @transform_9, window_bounds = array<i64: 8, 128>}]} {
    %c0 = arith.constant 0 : index
    %c0_0 = arith.constant 0 : index
    %0 = vector.load %arg1[%c0, %c0_0] : memref<8x32xf32, #tpu.memory_space<vmem>>, vector<8x32xf32>
    %c0_1 = arith.constant 0 : index
    %c0_2 = arith.constant 0 : index
    %1 = vector.load %arg2[%c0_1, %c0_2] : memref<32x32xf32, #tpu.memory_space<vmem>>, vector<32x32xf32>
    %cst = arith.constant dense<0.000000e+00> : vector<8x32xf32>
    %2 = tpu.matmul %0, %1, %cst {dimension_numbers = #tpu.dot_dimension_numbers<[1], [0], [0], [1], [0, 0, 1, 1], [], []>} : vector<8x32xf32>, vector<32x32xf32>, vector<8x32xf32> -> vector<8x32xf32>
    %c0_3 = arith.constant 0 : index
    %c0_4 = arith.constant 0 : index
    %3 = vector.load %arg3[%c0_3, %c0_4] : memref<1x32xf32, #tpu.memory_space<vmem>>, vector<1x32xf32>
    %4 = vector.broadcast %3 : vector<1x32xf32> to vector<8x32xf32>
    %5 = arith.addf %2, %4 : vector<8x32xf32>
    %cst_5 = arith.constant 0.000000e+00 : f32
    %6 = vector.broadcast %cst_5 : f32 to vector<8x32xf32>
    %7 = arith.maximumf %5, %6 : vector<8x32xf32>
    %c0_6 = arith.constant 0 : index
    %c0_7 = arith.constant 0 : index
    %8 = vector.load %arg4[%c0_6, %c0_7] : memref<32x32xf32, #tpu.memory_space<vmem>>, vector<32x32xf32>
    %cst_8 = arith.constant dense<0.000000e+00> : vector<8x32xf32>
    %9 = tpu.matmul %7, %8, %cst_8 {dimension_numbers = #tpu.dot_dimension_numbers<[1], [0], [0], [1], [0, 0, 1, 1], [], []>} : vector<8x32xf32>, vector<32x32xf32>, vector<8x32xf32> -> vector<8x32xf32>
    %c0_9 = arith.constant 0 : index
    %c0_10 = arith.constant 0 : index
    %10 = vector.load %arg5[%c0_9, %c0_10] : memref<1x32xf32, #tpu.memory_space<vmem>>, vector<1x32xf32>
    %11 = vector.broadcast %10 : vector<1x32xf32> to vector<8x32xf32>
    %12 = arith.addf %9, %11 : vector<8x32xf32>
    %cst_11 = arith.constant 0.000000e+00 : f32
    %13 = vector.broadcast %cst_11 : f32 to vector<8x32xf32>
    %14 = arith.maximumf %12, %13 : vector<8x32xf32>
    %c0_12 = arith.constant 0 : index
    %c0_13 = arith.constant 0 : index
    %15 = vector.load %arg6[%c0_12, %c0_13] : memref<32x32xf32, #tpu.memory_space<vmem>>, vector<32x32xf32>
    %cst_14 = arith.constant dense<0.000000e+00> : vector<8x32xf32>
    %16 = tpu.matmul %14, %15, %cst_14 {dimension_numbers = #tpu.dot_dimension_numbers<[1], [0], [0], [1], [0, 0, 1, 1], [], []>} : vector<8x32xf32>, vector<32x32xf32>, vector<8x32xf32> -> vector<8x32xf32>
    %c0_15 = arith.constant 0 : index
    %c0_16 = arith.constant 0 : index
    %17 = vector.load %arg7[%c0_15, %c0_16] : memref<1x32xf32, #tpu.memory_space<vmem>>, vector<1x32xf32>
    %18 = vector.broadcast %17 : vector<1x32xf32> to vector<8x32xf32>
    %19 = arith.addf %16, %18 : vector<8x32xf32>
    %cst_17 = arith.constant 0.000000e+00 : f32
    %20 = vector.broadcast %cst_17 : f32 to vector<8x32xf32>
    %21 = arith.maximumf %19, %20 : vector<8x32xf32>
    %c0_18 = arith.constant 0 : index
    %c0_19 = arith.constant 0 : index
    %22 = vector.load %arg8[%c0_18, %c0_19] : memref<32x128xf32, #tpu.memory_space<vmem>>, vector<32x128xf32>
    %cst_20 = arith.constant dense<0.000000e+00> : vector<8x128xf32>
    %23 = tpu.matmul %21, %22, %cst_20 {dimension_numbers = #tpu.dot_dimension_numbers<[1], [0], [0], [1], [0, 0, 1, 1], [], []>} : vector<8x32xf32>, vector<32x128xf32>, vector<8x128xf32> -> vector<8x128xf32>
    %c0_21 = arith.constant 0 : index
    %c0_22 = arith.constant 0 : index
    %24 = vector.load %arg9[%c0_21, %c0_22] : memref<1x128xf32, #tpu.memory_space<vmem>>, vector<1x128xf32>
    %25 = vector.broadcast %24 : vector<1x128xf32> to vector<8x128xf32>
    %26 = arith.addf %23, %25 : vector<8x128xf32>
    %c0_23 = arith.constant 0 : index
    %c0_24 = arith.constant 0 : index
    %27 = vector.load %arg10[%c0_23, %c0_24] : memref<8x128xf32, #tpu.memory_space<vmem>>, vector<8x128xf32>
    tpu.vector_store %arg10[%c0_23, %c0_24], %26 {strides = array<i32>} : memref<8x128xf32, #tpu.memory_space<vmem>>, vector<8x128xf32>,
    return
  }
  func.func @transform_0(%arg0: i32) -> (i32, i32) {
    %c0_i32 = arith.constant 0 : i32
    %c0_i32_0 = arith.constant 0 : i32
    return %arg0, %c0_i32 : i32, i32
  }
  func.func @transform_1(%arg0: i32) -> (i32, i32) {
    %c0_i32 = arith.constant 0 : i32
    %c0_i32_0 = arith.constant 0 : i32
    %c0_i32_1 = arith.constant 0 : i32
    return %c0_i32, %c0_i32_0 : i32, i32
  }
  func.func @transform_2(%arg0: i32) -> (i32, i32) {
    %c0_i32 = arith.constant 0 : i32
    %c0_i32_0 = arith.constant 0 : i32
    %c0_i32_1 = arith.constant 0 : i32
    return %c0_i32, %c0_i32_0 : i32, i32
  }
  func.func @transform_3(%arg0: i32) -> (i32, i32) {
    %c0_i32 = arith.constant 0 : i32
    %c0_i32_0 = arith.constant 0 : i32
    %c0_i32_1 = arith.constant 0 : i32
    return %c0_i32, %c0_i32_0 : i32, i32
  }
  func.func @transform_4(%arg0: i32) -> (i32, i32) {
    %c0_i32 = arith.constant 0 : i32
    %c0_i32_0 = arith.constant 0 : i32
    %c0_i32_1 = arith.constant 0 : i32
    return %c0_i32, %c0_i32_0 : i32, i32
  }
  func.func @transform_5(%arg0: i32) -> (i32, i32) {
    %c0_i32 = arith.constant 0 : i32
    %c0_i32_0 = arith.constant 0 : i32
    %c0_i32_1 = arith.constant 0 : i32
    return %c0_i32, %c0_i32_0 : i32, i32
  }
  func.func @transform_6(%arg0: i32) -> (i32, i32) {
    %c0_i32 = arith.constant 0 : i32
    %c0_i32_0 = arith.constant 0 : i32
    %c0_i32_1 = arith.constant 0 : i32
    return %c0_i32, %c0_i32_0 : i32, i32
  }
  func.func @transform_7(%arg0: i32) -> (i32, i32) {
    %c0_i32 = arith.constant 0 : i32
    %c0_i32_0 = arith.constant 0 : i32
    %c0_i32_1 = arith.constant 0 : i32
    return %c0_i32, %c0_i32_0 : i32, i32
  }
  func.func @transform_8(%arg0: i32) -> (i32, i32) {
    %c0_i32 = arith.constant 0 : i32
    %c0_i32_0 = arith.constant 0 : i32
    %c0_i32_1 = arith.constant 0 : i32
    return %c0_i32, %c0_i32_0 : i32, i32
  }
  func.func @transform_9(%arg0: i32) -> (i32, i32) {
    %c0_i32 = arith.constant 0 : i32
    %c0_i32_0 = arith.constant 0 : i32
    return %arg0, %c0_i32 : i32, i32
  }
}

</mosaic_0001>

<bundles_post_ra>
// kernel: tpu_custom_call.1
= control target key start
LH: loop header
LB: loop body
LE: loop exit
PB: predicated region body
PF: predicated region fallthrough
CT: control target
= control target key end

     0   :  { %14 = vsyncpa [#allocation3], 0  ;;  %s870_s0 = inlined_call_operand.hbm [shape: f32[8,32], index: 0, kind: input, shape index: {}]   ;;  %s871_s1 = inlined_call_operand.hbm [shape: f32[32,32], index: 1, kind: input, shape index: {}]   ;;  %s872_s2 = inlined_call_operand.vmem [shape: f32[1,32], index: 2, kind: input, shape index: {}]   ;;  %s873_s3 = inlined_call_operand.hbm [shape: f32[32,32], index: 3, kind: input, shape index: {}]   ;;  %s874_s4 = inlined_call_operand.vmem [shape: f32[1,32], index: 4, kind: input, shape index: {}]   ;;  %s875_s5 = inlined_call_operand.hbm [shape: f32[32,32], index: 5, kind: input, shape index: {}]   ;;  %s876_s6 = inlined_call_operand.vmem [shape: f32[1,32], index: 6, kind: input, shape index: {}]   ;;  %s877_s7 = inlined_call_operand.hbm [shape: f32[32,128], index: 7, kind: input, shape index: {}]   ;;  %s878_s8 = inlined_call_operand.vmem [shape: f32[1,128], index: 8, kind: input, shape index: {}]   ;;  %s879_s9 = inlined_call_operand.hbm [shape: f32[8,128], index: 9, kind: output, shape index: {}]  }
   0x1   :  { %15 = vsyncpa [#allocation6], 0 }
   0x2   :  { %16 = vsyncpa [#allocation9], 0 }
   0x3   :  { %17 = vsyncpa [#allocation4], 0  ;;  %s705_s30 = smov [#allocation5]   ;;  %s565_s13 = scalar_lea.hbm %s871_s1, 512 }
   0x4   :  { %s33_s10 = sshll.u32 %s705_s30, 4  ;;  %p566_p0 = scmp.ne.s32.totalorder %s871_s1, %s565_s13  ;;  %s34_s10 = int_to_ptr.vmem [resolvable:$true] %s33_s10 }
   0x5   :  { %p569_p1 = scmp.lt.u32.totalorder %s565_s13, %s871_s1 }
   0x7   :  { %p571_p2 = pnand %p569_p1, %p566_p0 }
   0x9   :  { %574 = shalt.err (!%p571_p2)
}
   0xa   :  { %s575_s18 = scalar_lea.vmem %s34_s10, 512  ;;  %p580_p4 = scmp.lt.s32.totalorder %s34_s10, %s34_s10 }
   0xb   :  { %p576_p3 = scmp.ne.s32.totalorder %s34_s10, %s575_s18  ;;  %p581_p5 = scmp.lt.s32.totalorder %s575_s18, %s575_s18 }
   0xd   :  { %p582_p6 = por %p581_p5, %p580_p4 }
   0xf   :  { %p583_p7 = pnand %p582_p6, %p576_p3 }
  0x11   :  { %586 = shalt.err (!%p583_p7)
}
  0x12   :  { %s706_s19 = smov 128   ;;  %s707_s20 = smov 8  }
  0x13   :  { %39 = dma.hbm_to_vmem [thread:$0]  %s871_s1, 512, %s34_s10, [#allocation6], %s706_s19, %s706_s19, %s707_s20  }
  0x14   :  { %s708_s23 = smov [#allocation8]   ;;  %s709_s25 = smov [#allocation2]  }
  0x15   :  { %s61_s24 = sshll.u32 %s708_s23, 4  ;;  %s24_s26 = sshll.u32 %s709_s25, 4  ;;  %s62_s24 = int_to_ptr.vmem [resolvable:$true] %s61_s24  ;;  %s25_s26 = int_to_ptr.vmem [resolvable:$true] %s24_s26 }
  0x16   :  { %s587_s29 = scalar_lea.hbm %s875_s5, 512 }
  0x17   :  { %p588_p8 = scmp.ne.s32.totalorder %s875_s5, %s587_s29  ;;  %p591_p9 = scmp.lt.u32.totalorder %s587_s29, %s875_s5 }
  0x19   :  { %p593_p10 = pnand %p591_p9, %p588_p8 }
  0x1b   :  { %596 = shalt.err (!%p593_p10)
}
  0x1c   :  { %s597_s1 = scalar_lea.vmem %s62_s24, 512  ;;  %p602_p12 = scmp.lt.s32.totalorder %s62_s24, %s62_s24 }
  0x1d   :  { %p598_p11 = scmp.ne.s32.totalorder %s62_s24, %s597_s1  ;;  %p603_p13 = scmp.lt.s32.totalorder %s597_s1, %s597_s1 }
  0x1f   :  { %p604_p0 = por %p603_p13, %p602_p12 }
  0x21   :  { %p605_p1 = pnand %p604_p0, %p598_p11 }
  0x23   :  { %608 = shalt.err (!%p605_p1)
}
  0x24   :  { %67 = dma.hbm_to_vmem [thread:$0]  %s875_s5, 512, %s62_s24, [#allocation9], %s706_s19, %s706_s19, %s707_s20  }
  0x25   :  { %s609_s17 = scalar_lea.hbm %s870_s0, 128 }
  0x26   :  { %p610_p2 = scmp.ne.s32.totalorder %s870_s0, %s609_s17  ;;  %p613_p3 = scmp.lt.u32.totalorder %s609_s17, %s870_s0 }
  0x28   :  { %p615_p4 = pnand %p613_p3, %p610_p2 }
  0x2a   :  { %618 = shalt.err (!%p615_p4)
}
  0x2b   :  { %s619_s25 = scalar_lea.vmem %s25_s26, 128  ;;  %p624_p6 = scmp.lt.s32.totalorder %s25_s26, %s25_s26 }
  0x2c   :  { %p620_p5 = scmp.ne.s32.totalorder %s25_s26, %s619_s25  ;;  %p625_p7 = scmp.lt.s32.totalorder %s619_s25, %s619_s25 }
  0x2e   :  { %p626_p8 = por %p625_p7, %p624_p6 }
  0x30   :  { %p627_p9 = pnand %p626_p8, %p620_p5 }
  0x32   :  { %630 = shalt.err (!%p627_p9)
}
  0x33   :  { %27 = dma.hbm_to_vmem [thread:$0]  %s870_s0, 128, %s25_s26, [#allocation3]  }
  0x34   :  { %s710_s27 = smov [#allocation7]   ;;  %s711_s29 = smov [#allocation10]  }
  0x35   :  { %s47_s28 = sshll.u32 %s710_s27, 4  ;;  %s75_s30 = sshll.u32 %s711_s29, 4  ;;  %s48_s28 = int_to_ptr.vmem [resolvable:$true] %s47_s28  ;;  %s76_s30 = int_to_ptr.vmem [resolvable:$true] %s75_s30 }
  0x36   :  { %s631_s13 = scalar_lea.hbm %s873_s3, 512 }
  0x37   :  { %p632_p10 = scmp.ne.s32.totalorder %s873_s3, %s631_s13  ;;  %p635_p11 = scmp.lt.u32.totalorder %s631_s13, %s873_s3 }
  0x39   :  { %p637_p12 = pnand %p635_p11, %p632_p10 }
  0x3b   :  { %640 = shalt.err (!%p637_p12)
}
  0x3c   :  { %s641_s0 = scalar_lea.vmem %s48_s28, 512  ;;  %p646_p0 = scmp.lt.s32.totalorder %s48_s28, %s48_s28 }
  0x3d   :  { %p642_p13 = scmp.ne.s32.totalorder %s48_s28, %s641_s0  ;;  %p647_p1 = scmp.lt.s32.totalorder %s641_s0, %s641_s0 }
  0x3f   :  { %p648_p2 = por %p647_p1, %p646_p0 }
  0x41   :  { %p649_p3 = pnand %p648_p2, %p642_p13 }
  0x43   :  { %652 = shalt.err (!%p649_p3)
}
  0x44   :  { %53 = dma.hbm_to_vmem [thread:$0]  %s873_s3, 512, %s48_s28, [#allocation6], %s706_s19, %s706_s19, %s707_s20  }
  0x45   :  { %s653_s21 = scalar_lea.hbm %s877_s7, 512 }
  0x46   :  { %p654_p4 = scmp.ne.s32.totalorder %s877_s7, %s653_s21  ;;  %p657_p5 = scmp.lt.u32.totalorder %s653_s21, %s877_s7 }
  0x48   :  { %p659_p6 = pnand %p657_p5, %p654_p4 }
  0x4a   :  { %662 = shalt.err (!%p659_p6)
}
  0x4b   :  { %s663_s24 = scalar_lea.vmem %s76_s30, 512  ;;  %p668_p8 = scmp.lt.s32.totalorder %s76_s30, %s76_s30 }
  0x4c   :  { %p664_p7 = scmp.ne.s32.totalorder %s76_s30, %s663_s24  ;;  %p669_p9 = scmp.lt.s32.totalorder %s663_s24, %s663_s24 }
  0x4e   :  { %p670_p10 = por %p669_p9, %p668_p8 }
  0x50   :  { %p671_p11 = pnand %p670_p10, %p664_p7 }
  0x52   :  { %674 = shalt.err (!%p671_p11)
}
  0x53   :  { %81 = dma.hbm_to_vmem [thread:$0]  %s877_s7, 512, %s76_s30, [#allocation9], %s706_s19, %s706_s19, %s707_s20  }
  0x54   :  { %697 = dma.done.wait [#allocation3], 128  }
  0x55   :  { %698 = vsyncadd [#allocation3], 4294967168 }
  0x56   :  { %699 = dma.done.wait [#allocation6], 1024  }
  0x57   :  { %700 = vsyncadd [#allocation6], 4294966272 }
  0x58   :  { %701 = dma.done.wait [#allocation9], 1024  }
  0x59   :  { %702 = vsyncadd [#allocation9], 4294966272  ;;  %v712_v0 = vmov 0.0|0.0   ;;  %vm713_vm0 = vmmov 0   ;;  %v714_v1 = vmov 0.0   ;;  %v100_v2 = vld [vmem:[#allocation5] sm:$0xff] }
  0x5a   :  { %530 = vmatprep.subr.bf16.mxu0 %v712_v0  ;;  %494 = vmatprep.mubr.msk.f32.mxu0 %vm713_vm0, %v714_v1  ;;  %v101_v3 = vld [vmem:[#allocation5 + $0x8] sm:$0xff]  ;;  %v102_v4 = vld [vmem:[#allocation5 + $0x10] sm:$0xff]  ;;  %v103_v6 = vld [vmem:[#allocation5 + $0x18] sm:$0xff]  ;;  %vm111_vm1 = vcmask 261120   ;;  %s715_s11 = smov [#allocation11]  }
  0x5b   :  { %536 = vmatprep.subr.bf16.mxu1 %v712_v0  ;;  %505 = vmatprep.mubr.msk.f32.mxu1 %vm713_vm0, %v714_v1  ;;  %v531_v5 = vpack.c.bf16 %v101_v3, %v100_v2  ;;  %v186_v7 = vld [vmem:[#allocation7] sm:$0xff]  ;;  %v187_v8 = vld [vmem:[#allocation7 + $0x8] sm:$0xff]  ;;  %v534_v9 = vpack.c.bf16 %v103_v6, %v102_v4  ;;  %v99_v11 = vld [vmem:[#allocation2] sm:$0xff]  ;;  %s447_s12 = sshll.u32 %s715_s11, 4  ;;  %s448_s12 = int_to_ptr.vmem [resolvable:$true] %s447_s12 }
  0x5c   :  { %v537_v10 = vpack.c.bf16 %v187_v8, %v186_v7  ;;  %v188_v12 = vld [vmem:[#allocation7 + $0x10] sm:$0xff]  ;;  %v189_v13 = vld [vmem:[#allocation7 + $0x18] sm:$0xff]  ;;  %v271_v15 = vld [vmem:[#allocation8] sm:$0xff]  ;;  %s675_s13 = scalar_lea.vmem %s448_s12, 128  ;;  %p680_p13 = scmp.lt.s32.totalorder %s448_s12, %s448_s12 }
  0x5d   :  { %532 = vmatpush3.bf16.msra.mxu0 %v531_v5  ;;  %v540_v14 = vpack.c.bf16 %v189_v13, %v188_v12  ;;  %v272_v16 = vld [vmem:[#allocation8 + $0x8] sm:$0xff]  ;;  %v458_v18 = vld [vmem:[%s872_s2] ss:$0 sm:$0xff]  ;;  %v273_v23 = vld [vmem:[#allocation8 + $0x10] sm:$0xff]  ;;  %p676_p12 = scmp.ne.s32.totalorder %s448_s12, %s675_s13  ;;  %p681_p0 = scmp.lt.s32.totalorder %s675_s13, %s675_s13 }
  0x5e   :  { %533 = vmatprep.subr.bf16.mxu0 %v712_v0  ;;  %538 = vmatpush3.bf16.msra.mxu1 %v537_v10  ;;  %v543_v17 = vpack.c.bf16 %v272_v16, %v271_v15  ;;  %v274_v24 = vld [vmem:[#allocation8 + $0x18] sm:$0xff]  ;;  %v356_v26 = vld [vmem:[#allocation10] sm:$0xff]  ;;  %v357_v27 = vld [vmem:[#allocation10 + $0x8] sm:$0xff] }
  0x5f   :  { %539 = vmatprep.subr.bf16.mxu1 %v712_v0  ;;  %v546_v25 = vpack.c.bf16 %v274_v24, %v273_v23  ;;  %v549_v28 = vpack.c.bf16 %v357_v27, %v356_v26  ;;  %v460_v29 = vld [vmem:[%s874_s4] ss:$0 sm:$0xff]  ;;  %v358_v34 = vld [vmem:[#allocation10 + $0x10] sm:$0xff]  ;;  %p682_p1 = por %p681_p0, %p680_p13 }
  0x60   :  { %v359_v35 = vld [vmem:[#allocation10 + $0x18] sm:$0xff] }
  0x61   :  { %535 = vmatpush3.bf16.msra.mxu0 %v534_v9  ;;  %v552_v36 = vpack.c.bf16 %v359_v35, %v358_v34  ;;  %v462_v37 = vld [vmem:[%s876_s6] ss:$0 sm:$0xff]  ;;  %p683_p2 = pnand %p682_p1, %p676_p12 }
  0x62   :  { %542 = vmatprep.subr.bf16.mxu0 %v712_v0  ;;  %541 = vmatpush3.bf16.msra.mxu1 %v540_v14  ;;  %v464_v42 = vld [vmem:[%s878_s8] ss:$0 sm:$0xff] }
  0x63   :  { %548 = vmatprep.subr.bf16.mxu1 %v712_v0 }
  0x64   :  { %495 = vmatmul.mubr.msk.f32.vlgmr.msra.gmra.mrb[0].mxu0 %vm111_vm1, %v99_v11 }
  0x65   :  { %516 = vmatprep.mubr.msk.f32.mxu0 %vm713_vm0, %v714_v1  ;;  %544 = vmatpush3.bf16.msra.mxu0 %v543_v17 }
  0x66   :  { %545 = vmatprep.subr.bf16.mxu0 %v712_v0 }
  0x69   :  { %547 = vmatpush3.bf16.msra.mxu0 %v546_v25 }
 0x137   :  { %v181_v19 = vpop.f32.mrb[0].mxu0 }
 0x138   :  { %v182_v20 = vadd.f32 %v458_v18, %v181_v19  ;;  %v496_v21 = vpop.f32.mrb[1].mxu0 }
 0x13a   :  { %v185_v22 = vmax.f32 %v182_v20, 0.0 }
 0x13c   :  { %506 = vmatmul.mubr.msk.f32.vlgmr.msra.gmra.mrb[0].mxu1 %vm111_vm1, %v185_v22 }
 0x13d   :  { %527 = vmatprep.mubr.msk.f32.mxu1 %vm713_vm0, %v714_v1  ;;  %550 = vmatpush3.bf16.msra.mxu1 %v549_v28 }
 0x13e   :  { %551 = vmatprep.subr.bf16.mxu1 %v712_v0 }
 0x141   :  { %553 = vmatpush3.bf16.msra.mxu1 %v552_v36 }
 0x20f   :  { %v266_v30 = vpop.f32.mrb[0].mxu1 }
 0x210   :  { %v267_v31 = vadd.f32 %v460_v29, %v266_v30  ;;  %v507_v32 = vpop.f32.mrb[1].mxu1 }
 0x212   :  { %v270_v33 = vmax.f32 %v267_v31, 0.0 }
 0x214   :  { %517 = vmatmul.mubr.msk.f32.vlgmr.msra.gmra.mrb[2].mxu0 %vm111_vm1, %v270_v33 }
 0x2e7   :  { %v351_v38 = vpop.f32.mrb[2].mxu0 }
 0x2e8   :  { %v352_v39 = vadd.f32 %v462_v37, %v351_v38  ;;  %v518_v40 = vpop.f32.mrb[3].mxu0 }
 0x2ea   :  { %v355_v41 = vmax.f32 %v352_v39, 0.0 }
 0x2ec   :  { %528 = vmatmul.mubr.msk.f32.vlgmr.msra.gmra.mrb[2].mxu1 %vm111_vm1, %v355_v41 }
 0x3bf   :  { %v436_v43 = vpop.f32.mrb[2].mxu1 }
 0x3c0   :  { %v437_v44 = vadd.f32 %v464_v42, %v436_v43  ;;  %v529_v45 = vpop.f32.mrb[3].mxu1 }
 0x3c2   :  { %440 = vst [vmem:[#allocation11] sm:$0xff] %v437_v44 }
 0x3c3   :  { %686 = shalt.err (!%p683_p2)
}
 0x3c4   :  { %s687_s10 = scalar_lea.hbm %s879_s9, 128 }
 0x3c5   :  { %p688_p3 = scmp.ne.s32.totalorder %s879_s9, %s687_s10  ;;  %p691_p4 = scmp.lt.u32.totalorder %s687_s10, %s879_s9 }
 0x3c7   :  { %p693_p5 = pnand %p691_p4, %p688_p3 }
 0x3c9   :  { %696 = shalt.err (!%p693_p5)
}
 0x3ca   :  { %450 = dma.vmem_to_hbm [thread:$0]  %s448_s12, 128, %s879_s9, [#allocation4]  }
 0x3cb   :  { %703 = dma.done.wait [#allocation4], 128  }
 0x3cc   :  { %704 = vsyncadd [#allocation4], 4294967168 }
 0x3cd   :  { %454 = vsyncpa [#allocation3], 1 }
 0x3ce   :  { %455 = vsyncpa [#allocation6], 1 }
 0x3cf   :  { %456 = vsyncpa [#allocation9], 1 }
 0x3d0   :  { %457 = vsyncpa [#allocation4], 1 }

// kernel: tpu_custom_call.1
= control target key start
LH: loop header
LB: loop body
LE: loop exit
PB: predicated region body
PF: predicated region fallthrough
CT: control target
= control target key end

     0   :  { %14 = vsyncpa [#allocation3], 0  ;;  %s870_s0 = inlined_call_operand.hbm [shape: f32[8,32], index: 0, kind: input, shape index: {}]   ;;  %s871_s1 = inlined_call_operand.hbm [shape: f32[32,32], index: 1, kind: input, shape index: {}]   ;;  %s872_s2 = inlined_call_operand.vmem [shape: f32[1,32], index: 2, kind: input, shape index: {}]   ;;  %s873_s3 = inlined_call_operand.hbm [shape: f32[32,32], index: 3, kind: input, shape index: {}]   ;;  %s874_s4 = inlined_call_operand.vmem [shape: f32[1,32], index: 4, kind: input, shape index: {}]   ;;  %s875_s5 = inlined_call_operand.hbm [shape: f32[32,32], index: 5, kind: input, shape index: {}]   ;;  %s876_s6 = inlined_call_operand.vmem [shape: f32[1,32], index: 6, kind: input, shape index: {}]   ;;  %s877_s7 = inlined_call_operand.hbm [shape: f32[32,128], index: 7, kind: input, shape index: {}]   ;;  %s878_s8 = inlined_call_operand.vmem [shape: f32[1,128], index: 8, kind: input, shape index: {}]   ;;  %s879_s9 = inlined_call_operand.hbm [shape: f32[8,128], index: 9, kind: output, shape index: {}]  }
   0x1   :  { %15 = vsyncpa [#allocation6], 0 }
   0x2   :  { %16 = vsyncpa [#allocation9], 0 }
   0x3   :  { %17 = vsyncpa [#allocation4], 0  ;;  %s705_s30 = smov [#allocation5]   ;;  %s565_s13 = scalar_lea.hbm %s871_s1, 512 }
   0x4   :  { %s33_s10 = sshll.u32 %s705_s30, 4  ;;  %p566_p0 = scmp.ne.s32.totalorder %s871_s1, %s565_s13  ;;  %s34_s10 = int_to_ptr.vmem [resolvable:$true] %s33_s10 }
   0x5   :  { %p569_p1 = scmp.lt.u32.totalorder %s565_s13, %s871_s1 }
   0x7   :  { %p571_p2 = pnand %p569_p1, %p566_p0 }
   0x9   :  { %574 = shalt.err (!%p571_p2)
}
   0xa   :  { %s575_s18 = scalar_lea.vmem %s34_s10, 512  ;;  %p580_p4 = scmp.lt.s32.totalorder %s34_s10, %s34_s10 }
   0xb   :  { %p576_p3 = scmp.ne.s32.totalorder %s34_s10, %s575_s18  ;;  %p581_p5 = scmp.lt.s32.totalorder %s575_s18, %s575_s18 }
   0xd   :  { %p582_p6 = por %p581_p5, %p580_p4 }
   0xf   :  { %p583_p7 = pnand %p582_p6, %p576_p3 }
  0x11   :  { %586 = shalt.err (!%p583_p7)
}
  0x12   :  { %s706_s19 = smov 128   ;;  %s707_s20 = smov 8  }
  0x13   :  { %39 = dma.hbm_to_vmem [thread:$0]  %s871_s1, 512, %s34_s10, [#allocation6], %s706_s19, %s706_s19, %s707_s20  }
  0x14   :  { %s708_s23 = smov [#allocation8]   ;;  %s709_s25 = smov [#allocation2]  }
  0x15   :  { %s61_s24 = sshll.u32 %s708_s23, 4  ;;  %s24_s26 = sshll.u32 %s709_s25, 4  ;;  %s62_s24 = int_to_ptr.vmem [resolvable:$true] %s61_s24  ;;  %s25_s26 = int_to_ptr.vmem [resolvable:$true] %s24_s26 }
  0x16   :  { %s587_s29 = scalar_lea.hbm %s875_s5, 512 }
  0x17   :  { %p588_p8 = scmp.ne.s32.totalorder %s875_s5, %s587_s29  ;;  %p591_p9 = scmp.lt.u32.totalorder %s587_s29, %s875_s5 }
  0x19   :  { %p593_p10 = pnand %p591_p9, %p588_p8 }
  0x1b   :  { %596 = shalt.err (!%p593_p10)
}
  0x1c   :  { %s597_s1 = scalar_lea.vmem %s62_s24, 512  ;;  %p602_p12 = scmp.lt.s32.totalorder %s62_s24, %s62_s24 }
  0x1d   :  { %p598_p11 = scmp.ne.s32.totalorder %s62_s24, %s597_s1  ;;  %p603_p13 = scmp.lt.s32.totalorder %s597_s1, %s597_s1 }
  0x1f   :  { %p604_p0 = por %p603_p13, %p602_p12 }
  0x21   :  { %p605_p1 = pnand %p604_p0, %p598_p11 }
  0x23   :  { %608 = shalt.err (!%p605_p1)
}
  0x24   :  { %67 = dma.hbm_to_vmem [thread:$0]  %s875_s5, 512, %s62_s24, [#allocation9], %s706_s19, %s706_s19, %s707_s20  }
  0x25   :  { %s609_s17 = scalar_lea.hbm %s870_s0, 128 }
  0x26   :  { %p610_p2 = scmp.ne.s32.totalorder %s870_s0, %s609_s17  ;;  %p613_p3 = scmp.lt.u32.totalorder %s609_s17, %s870_s0 }
  0x28   :  { %p615_p4 = pnand %p613_p3, %p610_p2 }
  0x2a   :  { %618 = shalt.err (!%p615_p4)
}
  0x2b   :  { %s619_s25 = scalar_lea.vmem %s25_s26, 128  ;;  %p624_p6 = scmp.lt.s32.totalorder %s25_s26, %s25_s26 }
  0x2c   :  { %p620_p5 = scmp.ne.s32.totalorder %s25_s26, %s619_s25  ;;  %p625_p7 = scmp.lt.s32.totalorder %s619_s25, %s619_s25 }
  0x2e   :  { %p626_p8 = por %p625_p7, %p624_p6 }
  0x30   :  { %p627_p9 = pnand %p626_p8, %p620_p5 }
  0x32   :  { %630 = shalt.err (!%p627_p9)
}
  0x33   :  { %27 = dma.hbm_to_vmem [thread:$0]  %s870_s0, 128, %s25_s26, [#allocation3]  }
  0x34   :  { %s710_s27 = smov [#allocation7]   ;;  %s711_s29 = smov [#allocation10]  }
  0x35   :  { %s47_s28 = sshll.u32 %s710_s27, 4  ;;  %s75_s30 = sshll.u32 %s711_s29, 4  ;;  %s48_s28 = int_to_ptr.vmem [resolvable:$true] %s47_s28  ;;  %s76_s30 = int_to_ptr.vmem [resolvable:$true] %s75_s30 }
  0x36   :  { %s631_s13 = scalar_lea.hbm %s873_s3, 512 }
  0x37   :  { %p632_p10 = scmp.ne.s32.totalorder %s873_s3, %s631_s13  ;;  %p635_p11 = scmp.lt.u32.totalorder %s631_s13, %s873_s3 }
  0x39   :  { %p637_p12 = pnand %p635_p11, %p632_p10 }
  0x3b   :  { %640 = shalt.err (!%p637_p12)
}
  0x3c   :  { %s641_s0 = scalar_lea.vmem %s48_s28, 512  ;;  %p646_p0 = scmp.lt.s32.totalorder %s48_s28, %s48_s28 }
  0x3d   :  { %p642_p13 = scmp.ne.s32.totalorder %s48_s28, %s641_s0  ;;  %p647_p1 = scmp.lt.s32.totalorder %s641_s0, %s641_s0 }
  0x3f   :  { %p648_p2 = por %p647_p1, %p646_p0 }
  0x41   :  { %p649_p3 = pnand %p648_p2, %p642_p13 }
  0x43   :  { %652 = shalt.err (!%p649_p3)
}
  0x44   :  { %53 = dma.hbm_to_vmem [thread:$0]  %s873_s3, 512, %s48_s28, [#allocation6], %s706_s19, %s706_s19, %s707_s20  }
  0x45   :  { %s653_s21 = scalar_lea.hbm %s877_s7, 512 }
  0x46   :  { %p654_p4 = scmp.ne.s32.totalorder %s877_s7, %s653_s21  ;;  %p657_p5 = scmp.lt.u32.totalorder %s653_s21, %s877_s7 }
  0x48   :  { %p659_p6 = pnand %p657_p5, %p654_p4 }
  0x4a   :  { %662 = shalt.err (!%p659_p6)
}
  0x4b   :  { %s663_s24 = scalar_lea.vmem %s76_s30, 512  ;;  %p668_p8 = scmp.lt.s32.totalorder %s76_s30, %s76_s30 }
  0x4c   :  { %p664_p7 = scmp.ne.s32.totalorder %s76_s30, %s663_s24  ;;  %p669_p9 = scmp.lt.s32.totalorder %s663_s24, %s663_s24 }
  0x4e   :  { %p670_p10 = por %p669_p9, %p668_p8 }
  0x50   :  { %p671_p11 = pnand %p670_p10, %p664_p7 }
  0x52   :  { %674 = shalt.err (!%p671_p11)
}
  0x53   :  { %81 = dma.hbm_to_vmem [thread:$0]  %s877_s7, 512, %s76_s30, [#allocation9], %s706_s19, %s706_s19, %s707_s20  }
  0x54   :  { %697 = dma.done.wait [#allocation3], 128  }
  0x55   :  { %698 = vsyncadd [#allocation3], 4294967168 }
  0x56   :  { %699 = dma.done.wait [#allocation6], 1024  }
  0x57   :  { %700 = vsyncadd [#allocation6], 4294966272 }
  0x58   :  { %701 = dma.done.wait [#allocation9], 1024  }
  0x59   :  { %702 = vsyncadd [#allocation9], 4294966272  ;;  %v712_v0 = vmov 0.0|0.0   ;;  %vm713_vm0 = vmmov 0   ;;  %v714_v1 = vmov 0.0   ;;  %v100_v2 = vld [vmem:[#allocation5] sm:$0xff] }
  0x5a   :  { %530 = vmatprep.subr.bf16.mxu0 %v712_v0  ;;  %494 = vmatprep.mubr.msk.f32.mxu0 %vm713_vm0, %v714_v1  ;;  %v101_v3 = vld [vmem:[#allocation5 + $0x8] sm:$0xff]  ;;  %v102_v4 = vld [vmem:[#allocation5 + $0x10] sm:$0xff]  ;;  %v103_v6 = vld [vmem:[#allocation5 + $0x18] sm:$0xff]  ;;  %vm111_vm1 = vcmask 261120   ;;  %s715_s11 = smov [#allocation11]  }
  0x5b   :  { %536 = vmatprep.subr.bf16.mxu1 %v712_v0  ;;  %505 = vmatprep.mubr.msk.f32.mxu1 %vm713_vm0, %v714_v1  ;;  %v531_v5 = vpack.c.bf16 %v101_v3, %v100_v2  ;;  %v186_v7 = vld [vmem:[#allocation7] sm:$0xff]  ;;  %v187_v8 = vld [vmem:[#allocation7 + $0x8] sm:$0xff]  ;;  %v534_v9 = vpack.c.bf16 %v103_v6, %v102_v4  ;;  %v99_v11 = vld [vmem:[#allocation2] sm:$0xff]  ;;  %s447_s12 = sshll.u32 %s715_s11, 4  ;;  %s448_s12 = int_to_ptr.vmem [resolvable:$true] %s447_s12 }
  0x5c   :  { %v537_v10 = vpack.c.bf16 %v187_v8, %v186_v7  ;;  %v188_v12 = vld [vmem:[#allocation7 + $0x10] sm:$0xff]  ;;  %v189_v13 = vld [vmem:[#allocation7 + $0x18] sm:$0xff]  ;;  %v271_v15 = vld [vmem:[#allocation8] sm:$0xff]  ;;  %s675_s13 = scalar_lea.vmem %s448_s12, 128  ;;  %p680_p13 = scmp.lt.s32.totalorder %s448_s12, %s448_s12 }
  0x5d   :  { %532 = vmatpush3.bf16.msra.mxu0 %v531_v5  ;;  %v540_v14 = vpack.c.bf16 %v189_v13, %v188_v12  ;;  %v272_v16 = vld [vmem:[#allocation8 + $0x8] sm:$0xff]  ;;  %v458_v18 = vld [vmem:[%s872_s2] ss:$0 sm:$0xff]  ;;  %v273_v23 = vld [vmem:[#allocation8 + $0x10] sm:$0xff]  ;;  %p676_p12 = scmp.ne.s32.totalorder %s448_s12, %s675_s13  ;;  %p681_p0 = scmp.lt.s32.totalorder %s675_s13, %s675_s13 }
  0x5e   :  { %533 = vmatprep.subr.bf16.mxu0 %v712_v0  ;;  %538 = vmatpush3.bf16.msra.mxu1 %v537_v10  ;;  %v543_v17 = vpack.c.bf16 %v272_v16, %v271_v15  ;;  %v274_v24 = vld [vmem:[#allocation8 + $0x18] sm:$0xff]  ;;  %v356_v26 = vld [vmem:[#allocation10] sm:$0xff]  ;;  %v357_v27 = vld [vmem:[#allocation10 + $0x8] sm:$0xff] }
  0x5f   :  { %539 = vmatprep.subr.bf16.mxu1 %v712_v0  ;;  %v546_v25 = vpack.c.bf16 %v274_v24, %v273_v23  ;;  %v549_v28 = vpack.c.bf16 %v357_v27, %v356_v26  ;;  %v460_v29 = vld [vmem:[%s874_s4] ss:$0 sm:$0xff]  ;;  %v358_v34 = vld [vmem:[#allocation10 + $0x10] sm:$0xff]  ;;  %p682_p1 = por %p681_p0, %p680_p13 }
  0x60   :  { %v359_v35 = vld [vmem:[#allocation10 + $0x18] sm:$0xff] }
  0x61   :  { %535 = vmatpush3.bf16.msra.mxu0 %v534_v9  ;;  %v552_v36 = vpack.c.bf16 %v359_v35, %v358_v34  ;;  %v462_v37 = vld [vmem:[%s876_s6] ss:$0 sm:$0xff]  ;;  %p683_p2 = pnand %p682_p1, %p676_p12 }
  0x62   :  { %542 = vmatprep.subr.bf16.mxu0 %v712_v0  ;;  %541 = vmatpush3.bf16.msra.mxu1 %v540_v14  ;;  %v464_v42 = vld [vmem:[%s878_s8] ss:$0 sm:$0xff] }
  0x63   :  { %548 = vmatprep.subr.bf16.mxu1 %v712_v0 }
  0x64   :  { %495 = vmatmul.mubr.msk.f32.vlgmr.msra.gmra.mrb[0].mxu0 %vm111_vm1, %v99_v11 }
  0x65   :  { %516 = vmatprep.mubr.msk.f32.mxu0 %vm713_vm0, %v714_v1  ;;  %544 = vmatpush3.bf16.msra.mxu0 %v543_v17 }
  0x66   :  { %545 = vmatprep.subr.bf16.mxu0 %v712_v0 }
  0x69   :  { %547 = vmatpush3.bf16.msra.mxu0 %v546_v25 }
 0x137   :  { %v181_v19 = vpop.f32.mrb[0].mxu0 }
 0x138   :  { %v182_v20 = vadd.f32 %v458_v18, %v181_v19  ;;  %v496_v21 = vpop.f32.mrb[1].mxu0 }
 0x13a   :  { %v185_v22 = vmax.f32 %v182_v20, 0.0 }
 0x13c   :  { %506 = vmatmul.mubr.msk.f32.vlgmr.msra.gmra.mrb[0].mxu1 %vm111_vm1, %v185_v22 }
 0x13d   :  { %527 = vmatprep.mubr.msk.f32.mxu1 %vm713_vm0, %v714_v1  ;;  %550 = vmatpush3.bf16.msra.mxu1 %v549_v28 }
 0x13e   :  { %551 = vmatprep.subr.bf16.mxu1 %v712_v0 }
 0x141   :  { %553 = vmatpush3.bf16.msra.mxu1 %v552_v36 }
 0x20f   :  { %v266_v30 = vpop.f32.mrb[0].mxu1 }
 0x210   :  { %v267_v31 = vadd.f32 %v460_v29, %v266_v30  ;;  %v507_v32 = vpop.f32.mrb[1].mxu1 }
 0x212   :  { %v270_v33 = vmax.f32 %v267_v31, 0.0 }
 0x214   :  { %517 = vmatmul.mubr.msk.f32.vlgmr.msra.gmra.mrb[2].mxu0 %vm111_vm1, %v270_v33 }
 0x2e7   :  { %v351_v38 = vpop.f32.mrb[2].mxu0 }
 0x2e8   :  { %v352_v39 = vadd.f32 %v462_v37, %v351_v38  ;;  %v518_v40 = vpop.f32.mrb[3].mxu0 }
 0x2ea   :  { %v355_v41 = vmax.f32 %v352_v39, 0.0 }
 0x2ec   :  { %528 = vmatmul.mubr.msk.f32.vlgmr.msra.gmra.mrb[2].mxu1 %vm111_vm1, %v355_v41 }
 0x3bf   :  { %v436_v43 = vpop.f32.mrb[2].mxu1 }
 0x3c0   :  { %v437_v44 = vadd.f32 %v464_v42, %v436_v43  ;;  %v529_v45 = vpop.f32.mrb[3].mxu1 }
 0x3c2   :  { %440 = vst [vmem:[#allocation11] sm:$0xff] %v437_v44 }
 0x3c3   :  { %686 = shalt.err (!%p683_p2)
}
 0x3c4   :  { %s687_s10 = scalar_lea.hbm %s879_s9, 128 }
 0x3c5   :  { %p688_p3 = scmp.ne.s32.totalorder %s879_s9, %s687_s10  ;;  %p691_p4 = scmp.lt.u32.totalorder %s687_s10, %s879_s9 }
 0x3c7   :  { %p693_p5 = pnand %p691_p4, %p688_p3 }
 0x3c9   :  { %696 = shalt.err (!%p693_p5)
}
 0x3ca   :  { %450 = dma.vmem_to_hbm [thread:$0]  %s448_s12, 128, %s879_s9, [#allocation4]  }
 0x3cb   :  { %703 = dma.done.wait [#allocation4], 128  }
 0x3cc   :  { %704 = vsyncadd [#allocation4], 4294967168 }
 0x3cd   :  { %454 = vsyncpa [#allocation3], 1 }
 0x3ce   :  { %455 = vsyncpa [#allocation6], 1 }
 0x3cf   :  { %456 = vsyncpa [#allocation9], 1 }
 0x3d0   :  { %457 = vsyncpa [#allocation4], 1 }

</bundles_post_ra>
